<compile_context>
chip_gen: v6e
topology: v6e:2x2x1
jax: 0.10.0
libtpu: 0.0.40
codegen_flags: <defaults>
</compile_context>

<pallas_src>
import functools

import jax
import jax.numpy as jnp
from jax.experimental import pallas as pl
from jax.experimental.pallas import tpu as pltpu

STATE_DIM = 32
ACTION_DIM = 6
REPEAT_ACTION = 4
HIDDEN = 256
OUT_FEATURES = ACTION_DIM * REPEAT_ACTION   # 24
OUT_PAD = 128                               # lane-dense padded head width
BIAS_W = 2 * HIDDEN + OUT_PAD               # 640: concatenated bias buffer width
MAX_TILE_B = 512                            # cap on batch rows per grid step


def _round_up(n, m):
    return ((n + m - 1) // m) * m


def _num_tensorcores():
    """Best-effort TensorCores-per-chip (2 on v7x-class chips, else 1)."""
    try:
        dev = jax.devices()[0]
        n = getattr(dev, "num_cores", None)
        if n is not None:
            return max(1, int(n))
        kind = str(getattr(dev, "device_kind", "")).lower()
        if "v7" in kind or "7x" in kind:
            return 2
        return 1
    except Exception:
        return 1


def _resident_spec(shape):
    """Constant-index (VMEM-resident) BlockSpec; single-buffered when supported."""
    index_map = lambda i: (0,) * len(shape)
    try:
        return pl.BlockSpec(shape, index_map, pipeline_mode=pl.Buffered(1))
    except Exception:
        return pl.BlockSpec(shape, index_map)


def _policy_mlp_kernel(x_ref, w1_ref, w2_ref, w3_ref, b_ref, out_ref):
    # x_ref: (tb, STATE_DIM); w*_ref / b_ref are VMEM-resident across grid steps.
    compute_dtype = w1_ref.dtype
    b1 = b_ref[:, 0:HIDDEN]                                # (1, 256) f32
    b2 = b_ref[:, HIDDEN:2 * HIDDEN]                       # (1, 256) f32
    b3 = b_ref[:, 2 * HIDDEN:2 * HIDDEN + OUT_PAD]         # (1, 128) f32

    x = x_ref[...]

    # Linear(state_dim, 256) + ReLU   (MXU matmul, f32 accumulate)
    h1 = jnp.dot(x, w1_ref[...], preferred_element_type=jnp.float32) + b1
    h1 = jnp.maximum(h1, 0.0).astype(compute_dtype)

    # Linear(256, 256) + ReLU
    h2 = jnp.dot(h1, w2_ref[...], preferred_element_type=jnp.float32) + b2
    h2 = jnp.maximum(h2, 0.0).astype(compute_dtype)

    # Linear(256, action_dim * repeat_action), zero-padded to 128 lanes
    y = jnp.dot(h2, w3_ref[...], preferred_element_type=jnp.float32) + b3

    out_ref[...] = y   # f32, lane-dense unmasked store


def prepare_params(params):
    """One-time parameter preprocessing (hoisted out of the per-call forward).

    Pads the 24-wide head to 128 output lanes and concatenates the three biases
    into a single (1, 640) f32 buffer (one small DMA instead of three).
    """
    w3p = jnp.pad(params["w3"], ((0, 0), (0, OUT_PAD - OUT_FEATURES)))
    b3p = jnp.pad(params["b3"].astype(jnp.float32), ((0, OUT_PAD - OUT_FEATURES),))
    b_all = jnp.concatenate(
        [params["b1"].astype(jnp.float32),
         params["b2"].astype(jnp.float32),
         b3p]).reshape(1, BIAS_W)
    return {"w1": params["w1"], "w2": params["w2"], "w3p": w3p, "b_all": b_all}


@functools.partial(jax.jit, static_argnames=("tb",))
def _policy_forward_impl(x, w1, w2, w3p, b_all, *, tb):
    batch = x.shape[0]
    compute_dtype = w1.dtype

    if x.dtype != compute_dtype:
        x = x.astype(compute_dtype)
    padded_batch = _round_up(batch, tb)
    if padded_batch != batch:
        x = jnp.pad(x, ((0, padded_batch - batch), (0, 0)))

    grid = (padded_batch // tb,)

    # Right-sized VMEM budget derived from the static tile size:
    #   resident weights/bias + double-buffered x / out tiles + f32 h1/h2 slabs,
    #   with 2x headroom + 2 MiB compiler scratch.
    itemsize = jnp.dtype(compute_dtype).itemsize
    weight_bytes = (STATE_DIM * HIDDEN + HIDDEN * HIDDEN + HIDDEN * OUT_PAD) * itemsize \
                   + BIAS_W * 4
    act_bytes = 2 * tb * STATE_DIM * itemsize + 2 * tb * OUT_PAD * 4 + 2 * tb * HIDDEN * 4
    vmem_limit = int(2 * (weight_bytes + act_bytes) + (2 << 20))

    out = pl.pallas_call(
        _policy_mlp_kernel,
        out_shape=jax.ShapeDtypeStruct((padded_batch, OUT_PAD), jnp.float32),
        grid=grid,
        in_specs=[
            # Activations: one batch tile per grid step (streamed, double-buffered).
            pl.BlockSpec((tb, STATE_DIM), lambda i: (i, 0)),
            # Weights & biases: constant index_map, single-buffered, VMEM-resident.
            _resident_spec((STATE_DIM, HIDDEN)),
            _resident_spec((HIDDEN, HIDDEN)),
            _resident_spec((HIDDEN, OUT_PAD)),
            _resident_spec((1, BIAS_W)),
        ],
        out_specs=pl.BlockSpec((tb, OUT_PAD), lambda i: (i, 0)),
        compiler_params=pltpu.CompilerParams(
            # Batch tiles are independent -> shard across TCs on dual-core chips.
            dimension_semantics=("parallel",),
            vmem_limit_bytes=vmem_limit,
        ),
    )(x, w1, w2, w3p, b_all)

    # Glue: drop batch/lane padding, reshape to [-1, repeat_action, action_dim].
    logits = out[:batch, :OUT_FEATURES]
    return logits.reshape(batch, REPEAT_ACTION, ACTION_DIM)


def policy_net_forward(x, prepared_params, max_tile_b=MAX_TILE_B, num_cores=None):
    """PolicyNet forward.

    Args:
      x: [batch, state_dim] array.
      prepared_params: output of prepare_params() (do the prep once per param
        update, not per forward).
      max_tile_b: cap on batch rows per grid step.
      num_cores: TensorCores per chip (auto-detected if None).
    Returns:
      logits: [batch, repeat_action, action_dim] float32.
    """
    # NOTE: for an RL acting loop with batch~1-8 per env step, batch several
    # steps per call; at that size the cost is pure fixed overhead.
    if num_cores is None:
        num_cores = _num_tensorcores()
    batch = x.shape[0]
    compute_dtype = prepared_params["w1"].dtype
    row_align = 16 if compute_dtype == jnp.bfloat16 else 8   # bf16 packs 2 rows/sublane

    # Balanced tiles across cores (e.g. exactly 2 equal tiles on v7x), capped at
    # max_tile_b; on single-TC chips this is one big tile for typical batches.
    per_core = _round_up(pl.cdiv(max(batch, 1), num_cores), row_align)
    tb = max(row_align, min(_round_up(max_tile_b, row_align), per_core))

    return _policy_forward_impl(x, prepared_params["w1"], prepared_params["w2"],
                                prepared_params["w3p"], prepared_params["b_all"],
                                tb=tb)


def init_params(key, weight_dtype=jnp.float32):
    """Deterministic init mimicking PyTorch nn.Linear default
    (U(-1/sqrt(fan_in), 1/sqrt(fan_in)) for both weight and bias)."""
    def linear(k, fan_in, fan_out):
        kw, kb = jax.random.split(k)
        bound = 1.0 / jnp.sqrt(float(fan_in))
        # Stored [in, out] (pre-transposed vs. PyTorch's [out, in]).
        w = jax.random.uniform(kw, (fan_in, fan_out), jnp.float32,
                               minval=-bound, maxval=bound)
        b = jax.random.uniform(kb, (fan_out,), jnp.float32,
                               minval=-bound, maxval=bound)
        return w.astype(weight_dtype), b   # biases stay f32

    k1, k2, k3 = jax.random.split(key, 3)
    w1, b1 = linear(k1, STATE_DIM, HIDDEN)
    w2, b2 = linear(k2, HIDDEN, HIDDEN)
    w3, b3 = linear(k3, HIDDEN, ACTION_DIM * REPEAT_ACTION)
    return {"w1": w1, "b1": b1, "w2": w2, "b2": b2, "w3": w3, "b3": b3}


def _reference_forward(x, params):
    """Pure-JAX reference mirroring the kernel's dtype handling."""
    cdt = params["w1"].dtype
    f32 = jnp.float32
    xq = x.astype(cdt).astype(f32)
    w1 = params["w1"].astype(f32)
    w2 = params["w2"].astype(f32)
    w3 = params["w3"].astype(f32)
    h1 = jnp.maximum(xq @ w1 + params["b1"], 0.0).astype(cdt).astype(f32)
    h2 = jnp.maximum(h1 @ w2 + params["b2"], 0.0).astype(cdt).astype(f32)
    y = h2 @ w3 + params["b3"]
    return y.reshape(x.shape[0], REPEAT_ACTION, ACTION_DIM)


if __name__ == "__main__":
    key = jax.random.PRNGKey(0)
    k_params, k_x = jax.random.split(key)

    # f32 path: exact PyTorch-semantics numerics.
    batch = 64
    x = jax.random.normal(k_x, (batch, STATE_DIM), jnp.float32)
    raw_f32 = init_params(k_params, jnp.float32)
    prep_f32 = prepare_params(raw_f32)            # one-time prep, hoisted out of forward
    out_f32 = jax.block_until_ready(policy_net_forward(x, prep_f32))
    ref_f32 = jax.block_until_ready(_reference_forward(x, raw_f32))
    assert out_f32.shape == (batch, REPEAT_ACTION, ACTION_DIM), out_f32.shape
    assert jnp.allclose(out_f32, ref_f32, atol=1e-5, rtol=1e-5), "f32 mismatch"

    # bf16 weights/activations (f32 MXU accumulation), odd batch exercises padding.
    batch2 = 7
    x2 = jax.random.normal(k_x, (batch2, STATE_DIM), jnp.float32)
    raw_bf16 = init_params(k_params, jnp.bfloat16)
    prep_bf16 = prepare_params(raw_bf16)
    out_bf16 = jax.block_until_ready(policy_net_forward(x2, prep_bf16))
    ref_bf16 = jax.block_until_ready(_reference_forward(x2, raw_bf16))
    assert out_bf16.shape == (batch2, REPEAT_ACTION, ACTION_DIM), out_bf16.shape
    assert jnp.allclose(out_bf16, ref_bf16, atol=2e-2, rtol=2e-2), "bf16 mismatch"

    print("KERNEL_OK")
</pallas_src>

<mosaic_0001>
module attributes {stable_mosaic.version = 11 : i64} {
  func.func @_policy_mlp_kernel(%arg0: i32, %arg1: memref<64x32xf32, #tpu.memory_space<vmem>>, %arg2: memref<32x256xf32, #tpu.memory_space<vmem>>, %arg3: memref<256x256xf32, #tpu.memory_space<vmem>>, %arg4: memref<256x128xf32, #tpu.memory_space<vmem>>, %arg5: memref<1x640xf32, #tpu.memory_space<vmem>>, %arg6: memref<64x128xf32, #tpu.memory_space<vmem>>) attributes {dimension_semantics = [#tpu.dimension_semantics<parallel>], iteration_bounds = array<i64: 1>, scalar_prefetch = 0 : i64, scratch_operands = 0 : i64, tpu.core_type = #tpu.core_type<tc>, window_params = [{transform_indices = @transform_0, window_bounds = array<i64: 64, 32>}, {pipeline_mode = #tpu.pipeline_mode<synchronous>, transform_indices = @transform_1, window_bounds = array<i64: 32, 256>}, {pipeline_mode = #tpu.pipeline_mode<synchronous>, transform_indices = @transform_2, window_bounds = array<i64: 256, 256>}, {pipeline_mode = #tpu.pipeline_mode<synchronous>, transform_indices = @transform_3, window_bounds = array<i64: 256, 128>}, {pipeline_mode = #tpu.pipeline_mode<synchronous>, transform_indices = @transform_4, window_bounds = array<i64: 1, 640>}, {transform_indices = @transform_5, window_bounds = array<i64: 64, 128>}]} {
    %c0 = arith.constant 0 : index
    %c0_0 = arith.constant 0 : index
    %0 = vector.load %arg5[%c0, %c0_0] : memref<1x640xf32, #tpu.memory_space<vmem>>, vector<1x256xf32>
    %c0_1 = arith.constant 0 : index
    %c256 = arith.constant 256 : index
    %1 = vector.load %arg5[%c0_1, %c256] : memref<1x640xf32, #tpu.memory_space<vmem>>, vector<1x256xf32>
    %c0_2 = arith.constant 0 : index
    %c512 = arith.constant 512 : index
    %2 = vector.load %arg5[%c0_2, %c512] : memref<1x640xf32, #tpu.memory_space<vmem>>, vector<1x128xf32>
    %c0_3 = arith.constant 0 : index
    %c0_4 = arith.constant 0 : index
    %3 = vector.load %arg1[%c0_3, %c0_4] : memref<64x32xf32, #tpu.memory_space<vmem>>, vector<64x32xf32>
    %c0_5 = arith.constant 0 : index
    %c0_6 = arith.constant 0 : index
    %4 = vector.load %arg2[%c0_5, %c0_6] : memref<32x256xf32, #tpu.memory_space<vmem>>, vector<32x256xf32>
    %cst = arith.constant dense<0.000000e+00> : vector<64x256xf32>
    %5 = tpu.matmul %3, %4, %cst {dimension_numbers = #tpu.dot_dimension_numbers<[1], [0], [0], [1], [0, 0, 1, 1], [], []>} : vector<64x32xf32>, vector<32x256xf32>, vector<64x256xf32> -> vector<64x256xf32>
    %6 = vector.broadcast %0 : vector<1x256xf32> to vector<64x256xf32>
    %7 = arith.addf %5, %6 : vector<64x256xf32>
    %cst_7 = arith.constant 0.000000e+00 : f32
    %8 = vector.broadcast %cst_7 : f32 to vector<64x256xf32>
    %9 = arith.maximumf %7, %8 : vector<64x256xf32>
    %c0_8 = arith.constant 0 : index
    %c0_9 = arith.constant 0 : index
    %10 = vector.load %arg3[%c0_8, %c0_9] : memref<256x256xf32, #tpu.memory_space<vmem>>, vector<256x256xf32>
    %cst_10 = arith.constant dense<0.000000e+00> : vector<64x256xf32>
    %11 = tpu.matmul %9, %10, %cst_10 {dimension_numbers = #tpu.dot_dimension_numbers<[1], [0], [0], [1], [0, 0, 1, 1], [], []>} : vector<64x256xf32>, vector<256x256xf32>, vector<64x256xf32> -> vector<64x256xf32>
    %12 = vector.broadcast %1 : vector<1x256xf32> to vector<64x256xf32>
    %13 = arith.addf %11, %12 : vector<64x256xf32>
    %cst_11 = arith.constant 0.000000e+00 : f32
    %14 = vector.broadcast %cst_11 : f32 to vector<64x256xf32>
    %15 = arith.maximumf %13, %14 : vector<64x256xf32>
    %c0_12 = arith.constant 0 : index
    %c0_13 = arith.constant 0 : index
    %16 = vector.load %arg4[%c0_12, %c0_13] : memref<256x128xf32, #tpu.memory_space<vmem>>, vector<256x128xf32>
    %cst_14 = arith.constant dense<0.000000e+00> : vector<64x128xf32>
    %17 = tpu.matmul %15, %16, %cst_14 {dimension_numbers = #tpu.dot_dimension_numbers<[1], [0], [0], [1], [0, 0, 1, 1], [], []>} : vector<64x256xf32>, vector<256x128xf32>, vector<64x128xf32> -> vector<64x128xf32>
    %18 = vector.broadcast %2 : vector<1x128xf32> to vector<64x128xf32>
    %19 = arith.addf %17, %18 : vector<64x128xf32>
    %c0_15 = arith.constant 0 : index
    %c0_16 = arith.constant 0 : index
    %20 = vector.load %arg6[%c0_15, %c0_16] : memref<64x128xf32, #tpu.memory_space<vmem>>, vector<64x128xf32>
    tpu.vector_store %arg6[%c0_15, %c0_16], %19 {strides = array<i32>} : memref<64x128xf32, #tpu.memory_space<vmem>>, vector<64x128xf32>,
    return
  }
  func.func @transform_0(%arg0: i32) -> (i32, i32) {
    %c0_i32 = arith.constant 0 : i32
    %c0_i32_0 = arith.constant 0 : i32
    return %arg0, %c0_i32 : i32, i32
  }
  func.func @transform_1(%arg0: i32) -> (i32, i32) {
    %c0_i32 = arith.constant 0 : i32
    %c0_i32_0 = arith.constant 0 : i32
    %c0_i32_1 = arith.constant 0 : i32
    return %c0_i32, %c0_i32_0 : i32, i32
  }
  func.func @transform_2(%arg0: i32) -> (i32, i32) {
    %c0_i32 = arith.constant 0 : i32
    %c0_i32_0 = arith.constant 0 : i32
    %c0_i32_1 = arith.constant 0 : i32
    return %c0_i32, %c0_i32_0 : i32, i32
  }
  func.func @transform_3(%arg0: i32) -> (i32, i32) {
    %c0_i32 = arith.constant 0 : i32
    %c0_i32_0 = arith.constant 0 : i32
    %c0_i32_1 = arith.constant 0 : i32
    return %c0_i32, %c0_i32_0 : i32, i32
  }
  func.func @transform_4(%arg0: i32) -> (i32, i32) {
    %c0_i32 = arith.constant 0 : i32
    %c0_i32_0 = arith.constant 0 : i32
    %c0_i32_1 = arith.constant 0 : i32
    return %c0_i32, %c0_i32_0 : i32, i32
  }
  func.func @transform_5(%arg0: i32) -> (i32, i32) {
    %c0_i32 = arith.constant 0 : i32
    %c0_i32_0 = arith.constant 0 : i32
    return %arg0, %c0_i32 : i32, i32
  }
}

</mosaic_0001>

<bundles_post_ra>
// kernel: _policy_forward_impl.1
= control target key start
LH: loop header
LB: loop body
LE: loop exit
PB: predicated region body
PF: predicated region fallthrough
CT: control target
= control target key end

     0   :  { %10 = vsyncpa [#allocation3], 0  ;;  %s861_s0 = inlined_call_operand.vmem [shape: f32[64,32], index: 0, kind: input, shape index: {}]   ;;  %s862_s1 = inlined_call_operand.vmem [shape: f32[32,256], index: 1, kind: input, shape index: {}]   ;;  %s863_s2 = inlined_call_operand.hbm [shape: f32[256,256], index: 2, kind: input, shape index: {}]   ;;  %s864_s3 = inlined_call_operand.hbm [shape: f32[256,128], index: 3, kind: input, shape index: {}]   ;;  %s865_s4 = inlined_call_operand.vmem [shape: f32[1,640], index: 4, kind: input, shape index: {}]   ;;  %s866_s5 = inlined_call_operand.vmem [shape: f32[64,128], index: 5, kind: output, shape index: {}]  }
   0x1   :  { %11 = vsyncpa [#allocation5], 0  ;;  %s709_s18 = smov [#allocation2]  }
   0x2   :  { %s21_s19 = sshll.u32 %s709_s18, 4  ;;  %s22_s19 = int_to_ptr.vmem [resolvable:$true] %s21_s19 }
   0x3   :  { %s673_s20 = scalar_lea.vmem %s22_s19, 8192  ;;  %p678_p1 = scmp.lt.s32.totalorder %s22_s19, %s22_s19 }
   0x4   :  { %p674_p0 = scmp.ne.s32.totalorder %s22_s19, %s673_s20  ;;  %p679_p2 = scmp.lt.s32.totalorder %s673_s20, %s673_s20 }
   0x6   :  { %p680_p3 = por %p679_p2, %p678_p1 }
   0x8   :  { %p681_p4 = pnand %p680_p3, %p674_p0 }
   0xa   :  { %684 = shalt.err (!%p681_p4)
}
   0xb   :  { %s710_s21 = smov 256   ;;  %s711_s22 = smov 16  }
   0xc   :  { %27 = dma.hbm_to_vmem [thread:$0]  %s863_s2, 8192, %s22_s19, [#allocation3], %s710_s21, %s710_s21, %s711_s22  }
   0xd   :  { %s712_s25 = smov [#allocation4]  }
   0xe   :  { %s33_s26 = sshll.u32 %s712_s25, 4  ;;  %s34_s26 = int_to_ptr.vmem [resolvable:$true] %s33_s26 }
   0xf   :  { %s693_s27 = scalar_lea.vmem %s34_s26, 4096  ;;  %p698_p6 = scmp.lt.s32.totalorder %s34_s26, %s34_s26 }
  0x10   :  { %p694_p5 = scmp.ne.s32.totalorder %s34_s26, %s693_s27  ;;  %p699_p7 = scmp.lt.s32.totalorder %s693_s27, %s693_s27 }
  0x12   :  { %p700_p8 = por %p699_p7, %p698_p6 }
  0x14   :  { %p701_p9 = pnand %p700_p8, %p694_p5 }
  0x16   :  { %704 = shalt.err (!%p701_p9)
}
  0x17   :  { %s713_s28 = smov 128   ;;  %s714_s29 = smov 8  }
  0x18   :  { %39 = dma.hbm_to_vmem [thread:$0]  %s864_s3, 4096, %s34_s26, [#allocation5], %s713_s28, %s713_s28, %s714_s29  }
  0x19   :  { %705 = dma.done.wait [#allocation3], 8192  }
  0x1a   :  { %706 = vsyncadd [#allocation3], 4294959104 }
  0x1b   :  { %707 = dma.done.wait [#allocation5], 4096  }
  0x1c   :  { %708 = vsyncadd [#allocation5], 4294963200  ;;  %v715_v0 = vmov 0.0   ;;  %v66_v1 = vld [vmem:[%s862_s1 + $0x38] sm:$0xff]  ;;  %v65_v2 = vld [vmem:[%s862_s1 + $0x30] sm:$0xff]  ;;  %vm78_vm0 = vcmask 261120  }
  0x1d   :  { %167 = vmatprep.mubr.f32.mxu0 %v715_v0  ;;  %v64_v3 = vld [vmem:[%s862_s1 + $0x28] sm:$0xff]  ;;  %127 = vmatprep.subr.mxu0 %v66_v1  ;;  %v63_v4 = vld [vmem:[%s862_s1 + $0x20] sm:$0xff]  ;;  %v62_v5 = vld [vmem:[%s862_s1 + $0x18] sm:$0xff] }
  0x1e   :  { %128 = vmatpush1.msra.mxu0 %v65_v2  ;;  %v61_v6 = vld [vmem:[%s862_s1 + $0x10] sm:$0xff]  ;;  %v60_v7 = vld [vmem:[%s862_s1 + $0x8] sm:$0xff]  ;;  %v59_v8 = vld [vmem:[%s862_s1] sm:$0xff] }
  0x1f   :  { %129 = vmatprep.subr.mxu0 %v64_v3  ;;  %v263_v9 = vld [vmem:[#allocation2 + $0xf8] sm:$0xff]  ;;  %v262_v10 = vld [vmem:[#allocation2 + $0xf0] sm:$0xff]  ;;  %v51_v11 = vld [vmem:[%s861_s0] sm:$0xff] }
  0x20   :  { %130 = vmatpush1.msra.mxu0 %v63_v4  ;;  %307 = vmatprep.subr.mxu1 %v263_v9  ;;  %v261_v12 = vld [vmem:[#allocation2 + $0xe8] sm:$0xff]  ;;  %v260_v13 = vld [vmem:[#allocation2 + $0xe0] sm:$0xff]  ;;  %v259_v14 = vld [vmem:[#allocation2 + $0xd8] sm:$0xff] }
  0x21   :  { %131 = vmatprep.subr.mxu0 %v62_v5  ;;  %308 = vmatpush1.msra.mxu1 %v262_v10  ;;  %v258_v15 = vld [vmem:[#allocation2 + $0xd0] sm:$0xff]  ;;  %v257_v16 = vld [vmem:[#allocation2 + $0xc8] sm:$0xff]  ;;  %v256_v18 = vld [vmem:[#allocation2 + $0xc0] sm:$0xff] }
  0x22   :  { %132 = vmatpush1.msra.mxu0 %v61_v6  ;;  %309 = vmatprep.subr.mxu1 %v261_v12  ;;  %v52_v17 = vld [vmem:[%s861_s0 + $0x8] sm:$0xff]  ;;  %v255_v19 = vld [vmem:[#allocation2 + $0xb8] sm:$0xff]  ;;  %v254_v20 = vld [vmem:[#allocation2 + $0xb0] sm:$0xff] }
  0x23   :  { %133 = vmatprep.subr.mxu0 %v60_v7  ;;  %310 = vmatpush1.msra.mxu1 %v260_v13  ;;  %v253_v21 = vld [vmem:[#allocation2 + $0xa8] sm:$0xff]  ;;  %v53_v22 = vld [vmem:[%s861_s0 + $0x10] sm:$0xff]  ;;  %v252_v23 = vld [vmem:[#allocation2 + $0xa0] sm:$0xff] }
  0x24   :  { %134 = vmatpush1.msra.mxu0 %v59_v8  ;;  %311 = vmatprep.subr.mxu1 %v259_v14  ;;  %v251_v24 = vld [vmem:[#allocation2 + $0x98] sm:$0xff]  ;;  %v250_v25 = vld [vmem:[#allocation2 + $0x90] sm:$0xff]  ;;  %v249_v26 = vld [vmem:[#allocation2 + $0x88] sm:$0xff] }
  0x25   :  { %593 = vmatmul.mubr.msk.f32.vlgmr.msra.gmra.mxu0 %vm78_vm0, %v51_v11  ;;  %312 = vmatpush1.msra.mxu1 %v258_v15  ;;  %v54_v27 = vld [vmem:[%s861_s0 + $0x18] sm:$0xff]  ;;  %v248_v28 = vld [vmem:[#allocation2 + $0x80] sm:$0xff]  ;;  %v246_v30 = vld [vmem:[#allocation2 + $0x70] sm:$0xff] }
  0x26   :  { %173 = vmatprep.mubr.f32.mxu0 %v715_v0  ;;  %313 = vmatprep.subr.mxu1 %v257_v16  ;;  %v247_v29 = vld [vmem:[#allocation2 + $0x78] sm:$0xff]  ;;  %v245_v31 = vld [vmem:[#allocation2 + $0x68] sm:$0xff]  ;;  %v55_v32 = vld [vmem:[%s861_s0 + $0x20] sm:$0xff] }
  0x27   :  { %314 = vmatpush1.msra.mxu1 %v256_v18  ;;  %v244_v33 = vld [vmem:[#allocation2 + $0x60] sm:$0xff]  ;;  %v243_v34 = vld [vmem:[#allocation2 + $0x58] sm:$0xff]  ;;  %v242_v35 = vld [vmem:[#allocation2 + $0x50] sm:$0xff] }
  0x28   :  { %315 = vmatprep.subr.mxu1 %v255_v19  ;;  %v241_v36 = vld [vmem:[#allocation2 + $0x48] sm:$0xff]  ;;  %v240_v38 = vld [vmem:[#allocation2 + $0x40] sm:$0xff]  ;;  %v239_v39 = vld [vmem:[#allocation2 + $0x38] sm:$0xff] }
  0x29   :  { %594 = vmatmul.mubr.msk.f32.gmra.mxu0 %vm78_vm0, %v52_v17  ;;  %316 = vmatpush1.msra.mxu1 %v254_v20  ;;  %v56_v37 = vld [vmem:[%s861_s0 + $0x28] sm:$0xff]  ;;  %v238_v40 = vld [vmem:[#allocation2 + $0x30] sm:$0xff]  ;;  %v236_v43 = vld [vmem:[#allocation2 + $0x20] sm:$0xff] }
  0x2a   :  { %179 = vmatprep.mubr.f32.mxu0 %v715_v0  ;;  %317 = vmatprep.subr.mxu1 %v253_v21  ;;  %v237_v41 = vld [vmem:[#allocation2 + $0x28] sm:$0xff]  ;;  %v57_v42 = vld [vmem:[%s861_s0 + $0x30] sm:$0xff]  ;;  %v235_v44 = vld [vmem:[#allocation2 + $0x18] sm:$0xff] }
  0x2b   :  { %318 = vmatpush1.msra.mxu1 %v252_v23  ;;  %v234_v45 = vld [vmem:[#allocation2 + $0x10] sm:$0xff]  ;;  %v233_v46 = vld [vmem:[#allocation2 + $0x8] sm:$0xff]  ;;  %v58_v47 = vld [vmem:[%s861_s0 + $0x38] sm:$0xff] }
  0x2c   :  { %319 = vmatprep.subr.mxu1 %v251_v24  ;;  %v232_v48 = vld [vmem:[#allocation2] sm:$0xff]  ;;  %v295_v49 = vld [vmem:[#allocation2 + $0x1f8] sm:$0xff]  ;;  %v294_v50 = vld [vmem:[#allocation2 + $0x1f0] sm:$0xff] }
  0x2d   :  { %595 = vmatmul.mubr.msk.f32.gmra.mxu0 %vm78_vm0, %v53_v22  ;;  %320 = vmatpush1.msra.mxu1 %v250_v25  ;;  %v293_v51 = vld [vmem:[#allocation2 + $0x1e8] sm:$0xff]  ;;  %v292_v52 = vld [vmem:[#allocation2 + $0x1e0] sm:$0xff]  ;;  %v291_v53 = vld [vmem:[#allocation2 + $0x1d8] sm:$0xff] }
  0x2e   :  { %185 = vmatprep.mubr.f32.mxu0 %v715_v0  ;;  %321 = vmatprep.subr.mxu1 %v249_v26  ;;  %v290_v54 = vld [vmem:[#allocation2 + $0x1d0] sm:$0xff]  ;;  %v289_v55 = vld [vmem:[#allocation2 + $0x1c8] sm:$0xff]  ;;  %v288_v56 = vld [vmem:[#allocation2 + $0x1c0] sm:$0xff] }
  0x2f   :  { %322 = vmatpush1.msra.mxu1 %v248_v28  ;;  %v287_v57 = vld [vmem:[#allocation2 + $0x1b8] sm:$0xff]  ;;  %v286_v58 = vld [vmem:[#allocation2 + $0x1b0] sm:$0xff]  ;;  %v285_v59 = vld [vmem:[#allocation2 + $0x1a8] sm:$0xff] }
  0x30   :  { %323 = vmatprep.subr.mxu1 %v247_v29  ;;  %v284_v60 = vld [vmem:[#allocation2 + $0x1a0] sm:$0xff]  ;;  %v283_v61 = vld [vmem:[#allocation2 + $0x198] sm:$0xff]  ;;  %v282_v62 = vld [vmem:[#allocation2 + $0x190] sm:$0xff] }
  0x31   :  { %596 = vmatmul.mubr.msk.f32.gmra.mxu0 %vm78_vm0, %v54_v27  ;;  %324 = vmatpush1.msra.mxu1 %v246_v30  ;;  %v281_v63 = vld [vmem:[#allocation2 + $0x188] sm:$0xff]  ;;  %v279_v1 = vld [vmem:[#allocation2 + $0x178] sm:$0xff]  ;;  %v278_v2 = vld [vmem:[#allocation2 + $0x170] sm:$0xff] }
  0x32   :  { %191 = vmatprep.mubr.f32.mxu0 %v715_v0  ;;  %325 = vmatprep.subr.mxu1 %v245_v31  ;;  %v277_v3 = vld [vmem:[#allocation2 + $0x168] sm:$0xff]  ;;  %v276_v4 = vld [vmem:[#allocation2 + $0x160] sm:$0xff]  ;;  %v275_v5 = vld [vmem:[#allocation2 + $0x158] sm:$0xff] }
  0x33   :  { %326 = vmatpush1.msra.mxu1 %v244_v33  ;;  %v274_v6 = vld [vmem:[#allocation2 + $0x150] sm:$0xff]  ;;  %v273_v7 = vld [vmem:[#allocation2 + $0x148] sm:$0xff]  ;;  %v272_v8 = vld [vmem:[#allocation2 + $0x140] sm:$0xff] }
  0x34   :  { %327 = vmatprep.subr.mxu1 %v243_v34  ;;  %v271_v9 = vld [vmem:[#allocation2 + $0x138] sm:$0xff]  ;;  %v270_v10 = vld [vmem:[#allocation2 + $0x130] sm:$0xff]  ;;  %v269_v11 = vld [vmem:[#allocation2 + $0x128] sm:$0xff] }
  0x35   :  { %597 = vmatmul.mubr.msk.f32.gmra.mxu0 %vm78_vm0, %v55_v32  ;;  %328 = vmatpush1.msra.mxu1 %v242_v35  ;;  %v268_v12 = vld [vmem:[#allocation2 + $0x120] sm:$0xff]  ;;  %v267_v13 = vld [vmem:[#allocation2 + $0x118] sm:$0xff]  ;;  %v266_v14 = vld [vmem:[#allocation2 + $0x110] sm:$0xff] }
  0x36   :  { %197 = vmatprep.mubr.f32.mxu0 %v715_v0  ;;  %329 = vmatprep.subr.mxu1 %v241_v36  ;;  %v265_v15 = vld [vmem:[#allocation2 + $0x108] sm:$0xff]  ;;  %v264_v16 = vld [vmem:[#allocation2 + $0x100] sm:$0xff]  ;;  %v467_v17 = vld [vmem:[#allocation4 + $0xf8] sm:$0xff] }
  0x37   :  { %330 = vmatpush1.msra.mxu1 %v240_v38  ;;  %v451_v18 = vld [vmem:[#allocation4 + $0x78] sm:$0xff]  ;;  %v466_v19 = vld [vmem:[#allocation4 + $0xf0] sm:$0xff]  ;;  %602 = vmatprep.subr.mxu0 %v467_v17  ;;  %v465_v21 = vld [vmem:[#allocation4 + $0xe8] sm:$0xff] }
  0x38   :  { %331 = vmatprep.subr.mxu1 %v239_v39  ;;  %v450_v20 = vld [vmem:[#allocation4 + $0x70] sm:$0xff]  ;;  %603 = vmatpush3.msra.mxu0 %v451_v18  ;;  %v449_v22 = vld [vmem:[#allocation4 + $0x68] sm:$0xff]  ;;  %v464_v23 = vld [vmem:[#allocation4 + $0xe0] sm:$0xff] }
  0x39   :  { %598 = vmatmul.mubr.msk.f32.gmra.mxu0 %vm78_vm0, %v56_v37  ;;  %332 = vmatpush1.msra.mxu1 %v238_v40  ;;  %v448_v24 = vld [vmem:[#allocation4 + $0x60] sm:$0xff]  ;;  %v463_v25 = vld [vmem:[#allocation4 + $0xd8] sm:$0xff]  ;;  %v462_v27 = vld [vmem:[#allocation4 + $0xd0] sm:$0xff] }
  0x3a   :  { %203 = vmatprep.mubr.f32.mxu0 %v715_v0  ;;  %333 = vmatprep.subr.mxu1 %v237_v41  ;;  %v447_v26 = vld [vmem:[#allocation4 + $0x58] sm:$0xff]  ;;  %v446_v28 = vld [vmem:[#allocation4 + $0x50] sm:$0xff]  ;;  %v461_v29 = vld [vmem:[#allocation4 + $0xc8] sm:$0xff] }
  0x3b   :  { %334 = vmatpush1.msra.mxu1 %v236_v43  ;;  %604 = vmatprep.subr.mxu0 %v466_v19  ;;  %v445_v30 = vld [vmem:[#allocation4 + $0x48] sm:$0xff]  ;;  %v460_v31 = vld [vmem:[#allocation4 + $0xc0] sm:$0xff]  ;;  %v459_v33 = vld [vmem:[#allocation4 + $0xb8] sm:$0xff] }
  0x3c   :  { %335 = vmatprep.subr.mxu1 %v235_v44  ;;  %605 = vmatpush3.msra.mxu0 %v450_v20  ;;  %v444_v32 = vld [vmem:[#allocation4 + $0x40] sm:$0xff]  ;;  %v443_v34 = vld [vmem:[#allocation4 + $0x38] sm:$0xff]  ;;  %v458_v35 = vld [vmem:[#allocation4 + $0xb0] sm:$0xff] }
  0x3d   :  { %599 = vmatmul.mubr.msk.f32.gmra.mxu0 %vm78_vm0, %v57_v42  ;;  %336 = vmatpush1.msra.mxu1 %v234_v45  ;;  %v442_v36 = vld [vmem:[#allocation4 + $0x30] sm:$0xff]  ;;  %v457_v37 = vld [vmem:[#allocation4 + $0xa8] sm:$0xff]  ;;  %v456_v39 = vld [vmem:[#allocation4 + $0xa0] sm:$0xff]  ;;  %v68_v42 = vlaneseq }
  0x3e   :  { %209 = vmatprep.mubr.f32.mxu0 %v715_v0  ;;  %337 = vmatprep.subr.mxu1 %v233_v46  ;;  %v280_v0 = vld [vmem:[#allocation2 + $0x180] sm:$0xff]  ;;  %v441_v38 = vld [vmem:[#allocation4 + $0x28] sm:$0xff]  ;;  %v455_v41 = vld [vmem:[#allocation4 + $0x98] sm:$0xff] }
  0x3f   :  { %338 = vmatpush1.msra.mxu1 %v232_v48  ;;  %606 = vmatprep.subr.mxu0 %v465_v21  ;;  %v440_v40 = vld [vmem:[#allocation4 + $0x20] sm:$0xff]  ;;  %v816_v43 = vshrl.u32 %v68_v42, 7 }
  0x40   :  { %339 = vmatprep.subr.mxu1 %v295_v49  ;;  %607 = vmatpush3.msra.mxu0 %v449_v22  ;;  %v48_v45 = vld [vmem:[%s865_s4] sm:$0x3] }
  0x41   :  { %600 = vmatmul.mubr.msk.f32.gmra.mxu0 %vm78_vm0, %v58_v47  ;;  %340 = vmatpush2.msra.mxu1 %v294_v50  ;;  %v70_v44 = vsub.s32 0, %v816_v43  ;;  %v74_v46 = vsub.s32 1, %v816_v43 }
  0x42   :  { %341 = vmatprep.subr.mxu1 %v293_v51  ;;  %608 = vmatprep.subr.mxu0 %v464_v23 }
  0x43   :  { %342 = vmatpush2.msra.mxu1 %v292_v52  ;;  %609 = vmatpush3.msra.mxu0 %v448_v24  ;;  %v71_v47 = vrot.slane %v48_v45, %v70_v44  ;;  %v75_v48 = vrot.slane %v48_v45, %v74_v46 }
  0x44   :  { %343 = vmatprep.subr.mxu1 %v291_v53  ;;  %610 = vmatprep.subr.mxu0 %v463_v25 }
  0x45   :  { %344 = vmatpush2.msra.mxu1 %v290_v54  ;;  %611 = vmatpush3.msra.mxu0 %v447_v26 }
  0x46   :  { %345 = vmatprep.subr.mxu1 %v289_v55  ;;  %612 = vmatprep.subr.mxu0 %v462_v27 }
  0x47   :  { %346 = vmatpush2.msra.mxu1 %v288_v56  ;;  %613 = vmatpush3.msra.mxu0 %v446_v28 }
  0x48   :  { %347 = vmatprep.subr.mxu1 %v287_v57  ;;  %614 = vmatprep.subr.mxu0 %v461_v29 }
  0x49   :  { %348 = vmatpush2.msra.mxu1 %v286_v58  ;;  %615 = vmatpush3.msra.mxu0 %v445_v30 }
  0x4a   :  { %349 = vmatprep.subr.mxu1 %v285_v59  ;;  %616 = vmatprep.subr.mxu0 %v460_v31 }
  0x4b   :  { %350 = vmatpush2.msra.mxu1 %v284_v60  ;;  %617 = vmatpush3.msra.mxu0 %v444_v32 }
  0x4c   :  { %351 = vmatprep.subr.mxu1 %v283_v61  ;;  %618 = vmatprep.subr.mxu0 %v459_v33  ;;  %v439_v33 = vld [vmem:[#allocation4 + $0x18] sm:$0xff] }
  0x4d   :  { %352 = vmatpush2.msra.mxu1 %v282_v62  ;;  %619 = vmatpush3.msra.mxu0 %v443_v34  ;;  %v454_v34 = vld [vmem:[#allocation4 + $0x90] sm:$0xff] }
  0x4e   :  { %353 = vmatprep.subr.mxu1 %v281_v63  ;;  %620 = vmatprep.subr.mxu0 %v458_v35  ;;  %v438_v35 = vld [vmem:[#allocation4 + $0x10] sm:$0xff] }
  0x4f   :  { %354 = vmatpush2.msra.mxu1 %v280_v0  ;;  %621 = vmatpush3.msra.mxu0 %v442_v36  ;;  %v453_v36 = vld [vmem:[#allocation4 + $0x88] sm:$0xff] }
  0x50   :  { %355 = vmatprep.subr.mxu1 %v279_v1  ;;  %622 = vmatprep.subr.mxu0 %v457_v37  ;;  %v437_v37 = vld [vmem:[#allocation4 + $0x8] sm:$0xff] }
  0x51   :  { %356 = vmatpush2.msra.mxu1 %v278_v2  ;;  %623 = vmatpush3.msra.mxu0 %v441_v38  ;;  %v452_v38 = vld [vmem:[#allocation4 + $0x80] sm:$0xff] }
  0x52   :  { %357 = vmatprep.subr.mxu1 %v277_v3  ;;  %624 = vmatprep.subr.mxu0 %v456_v39  ;;  %v436_v39 = vld [vmem:[#allocation4] sm:$0xff] }
  0x53   :  { %358 = vmatpush2.msra.mxu1 %v276_v4  ;;  %625 = vmatpush3.msra.mxu0 %v440_v40  ;;  %v49_v40 = vld [vmem:[%s865_s4 + $0x2] sm:$0x3] }
  0x54   :  { %359 = vmatprep.subr.mxu1 %v275_v5  ;;  %626 = vmatprep.subr.mxu0 %v455_v41  ;;  %v300_v41 = vrot.slane %v49_v40, %v70_v44  ;;  %v304_v42 = vrot.slane %v49_v40, %v74_v46 }
  0x55   :  { %360 = vmatpush2.msra.mxu1 %v274_v6  ;;  %627 = vmatpush3.msra.mxu0 %v439_v33 }
  0x56   :  { %361 = vmatprep.subr.mxu1 %v273_v7  ;;  %628 = vmatprep.subr.mxu0 %v454_v34 }
  0x57   :  { %362 = vmatpush2.msra.mxu1 %v272_v8  ;;  %629 = vmatpush3.msra.mxu0 %v438_v35 }
  0x58   :  { %363 = vmatprep.subr.mxu1 %v271_v9  ;;  %630 = vmatprep.subr.mxu0 %v453_v36 }
  0x59   :  { %364 = vmatpush2.msra.mxu1 %v270_v10  ;;  %631 = vmatpush3.msra.mxu0 %v437_v37 }
  0x5a   :  { %365 = vmatprep.subr.mxu1 %v269_v11  ;;  %632 = vmatprep.subr.mxu0 %v452_v38 }
  0x5b   :  { %366 = vmatpush2.msra.mxu1 %v268_v12  ;;  %633 = vmatpush3.msra.mxu0 %v436_v39 }
  0x5c   :  { %367 = vmatprep.subr.mxu1 %v267_v13 }
  0x5d   :  { %368 = vmatpush2.msra.mxu1 %v266_v14 }
  0x5e   :  { %369 = vmatprep.subr.mxu1 %v265_v15 }
  0x5f   :  { %370 = vmatpush2.msra.mxu1 %v264_v16 }
  0xe5   :  { %v169_v49 = vpop.f32.mrf.mxu0 }
  0xe6   :  { %v170_v50 = vadd.f32 %v169_v49, %v71_v47 }
  0xe7   :  { %v171_v51 = vpop.f32.mrf.mxu0 }
  0xe8   :  { %v172_v52 = vadd.f32 %v171_v51, %v75_v48  ;;  %v216_v55 = vmax.f32 %v170_v50, 0.0 }
  0xe9   :  { %v175_v53 = vpop.f32.mrf.mxu0 }
  0xea   :  { %v217_v54 = vmax.f32 %v172_v52, 0.0  ;;  %v176_v56 = vadd.f32 %v175_v53, %v71_v47 }
  0xeb   :  { %v177_v57 = vpop.f32.mrf.mxu0 }
  0xec   :  { %v178_v58 = vadd.f32 %v177_v57, %v75_v48  ;;  %371 = vmatprep.mubr.f32.mxu1 %v217_v54  ;;  %v218_v61 = vmax.f32 %v176_v56, 0.0 }
  0xed   :  { %v181_v59 = vpop.f32.mrf.mxu0  ;;  %372 = vmatmul.mubr.f32.vlgmr.msra.gmra.mxu1 %v216_v55 }
  0xee   :  { %v219_v60 = vmax.f32 %v178_v58, 0.0  ;;  %v182_v62 = vadd.f32 %v181_v59, %v71_v47 }
  0xef   :  { %v183_v63 = vpop.f32.mrf.mxu0 }
  0xf0   :  { %v184_v0 = vadd.f32 %v183_v63, %v75_v48  ;;  %377 = vmatprep.mubr.f32.mxu1 %v219_v60  ;;  %v220_v3 = vmax.f32 %v182_v62, 0.0 }
  0xf1   :  { %v187_v1 = vpop.f32.mrf.mxu0  ;;  %378 = vmatmul.mubr.f32.gmra.mxu1 %v218_v61 }
  0xf2   :  { %v221_v2 = vmax.f32 %v184_v0, 0.0  ;;  %v188_v4 = vadd.f32 %v187_v1, %v71_v47 }
  0xf3   :  { %v189_v5 = vpop.f32.mrf.mxu0 }
  0xf4   :  { %v190_v6 = vadd.f32 %v189_v5, %v75_v48  ;;  %383 = vmatprep.mubr.f32.mxu1 %v221_v2  ;;  %v222_v9 = vmax.f32 %v188_v4, 0.0 }
  0xf5   :  { %v193_v7 = vpop.f32.mrf.mxu0  ;;  %384 = vmatmul.mubr.f32.gmra.mxu1 %v220_v3 }
  0xf6   :  { %v223_v8 = vmax.f32 %v190_v6, 0.0  ;;  %v194_v10 = vadd.f32 %v193_v7, %v71_v47 }
  0xf7   :  { %v195_v11 = vpop.f32.mrf.mxu0 }
  0xf8   :  { %v196_v12 = vadd.f32 %v195_v11, %v75_v48  ;;  %389 = vmatprep.mubr.f32.mxu1 %v223_v8  ;;  %v224_v15 = vmax.f32 %v194_v10, 0.0 }
  0xf9   :  { %v199_v13 = vpop.f32.mrf.mxu0  ;;  %390 = vmatmul.mubr.f32.gmra.mxu1 %v222_v9 }
  0xfa   :  { %v225_v14 = vmax.f32 %v196_v12, 0.0  ;;  %v200_v16 = vadd.f32 %v199_v13, %v71_v47 }
  0xfb   :  { %v201_v17 = vpop.f32.mrf.mxu0 }
  0xfc   :  { %v202_v18 = vadd.f32 %v201_v17, %v75_v48  ;;  %395 = vmatprep.mubr.f32.mxu1 %v225_v14  ;;  %v226_v21 = vmax.f32 %v200_v16, 0.0 }
  0xfd   :  { %v205_v19 = vpop.f32.mrf.mxu0  ;;  %396 = vmatmul.mubr.f32.gmra.mxu1 %v224_v15 }
  0xfe   :  { %v227_v20 = vmax.f32 %v202_v18, 0.0  ;;  %v206_v22 = vadd.f32 %v205_v19, %v71_v47 }
  0xff   :  { %v207_v23 = vpop.f32.mrf.mxu0 }
 0x100   :  { %v208_v24 = vadd.f32 %v207_v23, %v75_v48  ;;  %401 = vmatprep.mubr.f32.mxu1 %v227_v20  ;;  %v228_v27 = vmax.f32 %v206_v22, 0.0 }
 0x101   :  { %v211_v25 = vpop.f32.mrf.mxu0  ;;  %402 = vmatmul.mubr.f32.gmra.mxu1 %v226_v21 }
 0x102   :  { %v229_v26 = vmax.f32 %v208_v24, 0.0  ;;  %v212_v28 = vadd.f32 %v211_v25, %v71_v47 }
 0x103   :  { %v213_v29 = vpop.f32.mrf.mxu0 }
 0x104   :  { %v214_v30 = vadd.f32 %v213_v29, %v75_v48  ;;  %407 = vmatprep.mubr.f32.mxu1 %v229_v26  ;;  %v230_v32 = vmax.f32 %v212_v28, 0.0  ;;  %v601_v28 = vld [vmem:[%s865_s4 + $0x4] ss:$0 sm:$0xff] }
 0x105   :  { %408 = vmatmul.mubr.f32.gmra.mxu1 %v228_v27 }
 0x106   :  { %v231_v31 = vmax.f32 %v214_v30, 0.0 }
 0x108   :  { %413 = vmatprep.mubr.f32.mxu1 %v231_v31 }
 0x109   :  { %414 = vmatmul.mubr.f32.gmra.mxu1 %v230_v32 }
 0x1ad   :  { %v373_v45 = vpop.f32.mrf.mxu1 }
 0x1ae   :  { %v374_v47 = vadd.f32 %v373_v45, %v300_v41 }
 0x1af   :  { %v375_v48 = vpop.f32.mrf.mxu1 }
 0x1b0   :  { %v376_v49 = vadd.f32 %v375_v48, %v304_v42  ;;  %v420_v52 = vmax.f32 %v374_v47, 0.0 }
 0x1b1   :  { %v379_v50 = vpop.f32.mrf.mxu1 }
 0x1b2   :  { %v421_v51 = vmax.f32 %v376_v49, 0.0  ;;  %v380_v53 = vadd.f32 %v379_v50, %v300_v41 }
 0x1b3   :  { %v381_v54 = vpop.f32.mrf.mxu1 }
 0x1b4   :  { %v382_v55 = vadd.f32 %v381_v54, %v304_v42  ;;  %538 = vmatprep.mubr.f32.mxu0 %v421_v51  ;;  %v422_v58 = vmax.f32 %v380_v53, 0.0 }
 0x1b5   :  { %v385_v56 = vpop.f32.mrf.mxu1  ;;  %539 = vmatmul.mubr.f32.vlgmr.msra.gmra.mxu0 %v420_v52 }
 0x1b6   :  { %v423_v57 = vmax.f32 %v382_v55, 0.0  ;;  %v386_v59 = vadd.f32 %v385_v56, %v300_v41 }
 0x1b7   :  { %v387_v44 = vpop.f32.mrf.mxu1 }
 0x1b8   :  { %v388_v60 = vadd.f32 %v387_v44, %v304_v42  ;;  %543 = vmatprep.mubr.f32.mxu0 %v423_v57  ;;  %v424_v61 = vmax.f32 %v386_v59, 0.0 }
 0x1b9   :  { %v391_v43 = vpop.f32.mrf.mxu1  ;;  %544 = vmatmul.mubr.f32.gmra.mxu0 %v422_v58 }
 0x1ba   :  { %v425_v46 = vmax.f32 %v388_v60, 0.0  ;;  %v392_v62 = vadd.f32 %v391_v43, %v300_v41 }
 0x1bb   :  { %v393_v63 = vpop.f32.mrf.mxu1 }
 0x1bc   :  { %v394_v0 = vadd.f32 %v393_v63, %v304_v42  ;;  %548 = vmatprep.mubr.f32.mxu0 %v425_v46  ;;  %v426_v3 = vmax.f32 %v392_v62, 0.0 }
 0x1bd   :  { %v397_v1 = vpop.f32.mrf.mxu1  ;;  %549 = vmatmul.mubr.f32.gmra.mxu0 %v424_v61 }
 0x1be   :  { %v427_v2 = vmax.f32 %v394_v0, 0.0  ;;  %v398_v4 = vadd.f32 %v397_v1, %v300_v41 }
 0x1bf   :  { %v399_v5 = vpop.f32.mrf.mxu1 }
 0x1c0   :  { %v400_v6 = vadd.f32 %v399_v5, %v304_v42  ;;  %553 = vmatprep.mubr.f32.mxu0 %v427_v2  ;;  %v428_v9 = vmax.f32 %v398_v4, 0.0 }
 0x1c1   :  { %v403_v7 = vpop.f32.mrf.mxu1  ;;  %554 = vmatmul.mubr.f32.gmra.mxu0 %v426_v3 }
 0x1c2   :  { %v429_v8 = vmax.f32 %v400_v6, 0.0  ;;  %v404_v10 = vadd.f32 %v403_v7, %v300_v41 }
 0x1c3   :  { %v405_v11 = vpop.f32.mrf.mxu1 }
 0x1c4   :  { %v406_v12 = vadd.f32 %v405_v11, %v304_v42  ;;  %558 = vmatprep.mubr.f32.mxu0 %v429_v8  ;;  %v430_v15 = vmax.f32 %v404_v10, 0.0 }
 0x1c5   :  { %v409_v13 = vpop.f32.mrf.mxu1  ;;  %559 = vmatmul.mubr.f32.gmra.mxu0 %v428_v9 }
 0x1c6   :  { %v431_v14 = vmax.f32 %v406_v12, 0.0  ;;  %v410_v16 = vadd.f32 %v409_v13, %v300_v41 }
 0x1c7   :  { %v411_v17 = vpop.f32.mrf.mxu1 }
 0x1c8   :  { %v412_v18 = vadd.f32 %v411_v17, %v304_v42  ;;  %563 = vmatprep.mubr.f32.mxu0 %v431_v14  ;;  %v432_v21 = vmax.f32 %v410_v16, 0.0 }
 0x1c9   :  { %v415_v19 = vpop.f32.mrf.mxu1  ;;  %564 = vmatmul.mubr.f32.gmra.mxu0 %v430_v15 }
 0x1ca   :  { %v433_v20 = vmax.f32 %v412_v18, 0.0  ;;  %v416_v22 = vadd.f32 %v415_v19, %v300_v41 }
 0x1cb   :  { %v417_v23 = vpop.f32.mrf.mxu1 }
 0x1cc   :  { %v418_v24 = vadd.f32 %v417_v23, %v304_v42  ;;  %568 = vmatprep.mubr.f32.mxu0 %v433_v20  ;;  %v434_v26 = vmax.f32 %v416_v22, 0.0 }
 0x1cd   :  { %569 = vmatmul.mubr.f32.gmra.mxu0 %v432_v21 }
 0x1ce   :  { %v435_v25 = vmax.f32 %v418_v24, 0.0 }
 0x1d0   :  { %573 = vmatprep.mubr.f32.mxu0 %v435_v25 }
 0x1d1   :  { %574 = vmatmul.mubr.f32.gmra.mxu0 %v434_v26 }
 0x275   :  { %v634_v27 = vpop.f32.mrf.mxu0 }
 0x277   :  { %v635_v29 = vpop.f32.mrf.mxu0 }
 0x278   :  { %v636_v30 = vadd.f32 %v635_v29, %v634_v27 }
 0x279   :  { %v637_v31 = vpop.f32.mrf.mxu0 }
 0x27a   :  { %v541_v32 = vadd.f32 %v636_v30, %v601_v28 }
 0x27b   :  { %v638_v33 = vpop.f32.mrf.mxu0 }
 0x27c   :  { %579 = vst [vmem:[%s866_s5] sm:$0xff] %v541_v32  ;;  %v639_v34 = vadd.f32 %v638_v33, %v637_v31 }
 0x27d   :  { %v640_v35 = vpop.f32.mrf.mxu0 }
 0x27e   :  { %v546_v36 = vadd.f32 %v639_v34, %v601_v28 }
 0x27f   :  { %v641_v37 = vpop.f32.mrf.mxu0 }
 0x280   :  { %580 = vst [vmem:[%s866_s5 + $0x8] sm:$0xff] %v546_v36  ;;  %v642_v38 = vadd.f32 %v641_v37, %v640_v35 }
 0x281   :  { %v643_v39 = vpop.f32.mrf.mxu0 }
 0x282   :  { %v551_v40 = vadd.f32 %v642_v38, %v601_v28 }
 0x283   :  { %v644_v41 = vpop.f32.mrf.mxu0 }
 0x284   :  { %581 = vst [vmem:[%s866_s5 + $0x10] sm:$0xff] %v551_v40  ;;  %v645_v42 = vadd.f32 %v644_v41, %v643_v39 }
 0x285   :  { %v646_v45 = vpop.f32.mrf.mxu0 }
 0x286   :  { %v556_v47 = vadd.f32 %v645_v42, %v601_v28 }
 0x287   :  { %v647_v48 = vpop.f32.mrf.mxu0 }
 0x288   :  { %582 = vst [vmem:[%s866_s5 + $0x18] sm:$0xff] %v556_v47  ;;  %v648_v49 = vadd.f32 %v647_v48, %v646_v45 }
 0x289   :  { %v649_v50 = vpop.f32.mrf.mxu0 }
 0x28a   :  { %v561_v51 = vadd.f32 %v648_v49, %v601_v28 }
 0x28b   :  { %v650_v52 = vpop.f32.mrf.mxu0 }
 0x28c   :  { %583 = vst [vmem:[%s866_s5 + $0x20] sm:$0xff] %v561_v51  ;;  %v651_v53 = vadd.f32 %v650_v52, %v649_v50 }
 0x28d   :  { %v652_v54 = vpop.f32.mrf.mxu0 }
 0x28e   :  { %v566_v55 = vadd.f32 %v651_v53, %v601_v28 }
 0x28f   :  { %v653_v56 = vpop.f32.mrf.mxu0 }
 0x290   :  { %584 = vst [vmem:[%s866_s5 + $0x28] sm:$0xff] %v566_v55  ;;  %v654_v57 = vadd.f32 %v653_v56, %v652_v54 }
 0x291   :  { %v655_v58 = vpop.f32.mrf.mxu0 }
 0x292   :  { %v571_v59 = vadd.f32 %v654_v57, %v601_v28 }
 0x293   :  { %v656_v44 = vpop.f32.mrf.mxu0 }
 0x294   :  { %585 = vst [vmem:[%s866_s5 + $0x30] sm:$0xff] %v571_v59  ;;  %v657_v60 = vadd.f32 %v656_v44, %v655_v58 }
 0x296   :  { %v576_v43 = vadd.f32 %v657_v60, %v601_v28 }
 0x298   :  { %586 = vst [vmem:[%s866_s5 + $0x38] sm:$0xff] %v576_v43 }
 0x299   :  { %591 = vsyncpa [#allocation3], 1 }
 0x29a   :  { %592 = vsyncpa [#allocation5], 1 }

</bundles_post_ra>
